<compile_context>
chip_gen: v7x
topology: tpu7x:2x2x1
jax: 0.10.0
libtpu: 0.0.40
codegen_flags: <defaults>
</compile_context>

<pallas_src>
import functools

import numpy as np
import jax
import jax.numpy as jnp
from jax.experimental import pallas as pl
from jax.experimental.pallas import tpu as pltpu


# ----------------------------------------------------------------------------
# host-side helpers: tiny per-sample resampling matrices
# ----------------------------------------------------------------------------
def _adaptive_avg_pool_matrix(t_in: int, t_out: int) -> np.ndarray:
    """nn.AdaptiveAvgPool1d(t_out) as a (t_out, t_in) linear map."""
    P = np.zeros((t_out, t_in), np.float32)
    for i in range(t_out):
        s = (i * t_in) // t_out
        e = -((-(i + 1) * t_in) // t_out)  # ceil((i+1)*t_in/t_out)
        P[i, s:e] = 1.0 / (e - s)
    return P


def _linear_upsample_matrix(t_in: int, t_out: int) -> np.ndarray:
    """nn.Upsample(size=t_out, mode='linear', align_corners=False) as a matrix."""
    P = np.zeros((t_out, t_in), np.float32)
    scale = t_in / t_out
    for i in range(t_out):
        src = max((i + 0.5) * scale - 0.5, 0.0)
        lo = min(int(np.floor(src)), t_in - 1)
        hi = min(lo + 1, t_in - 1)
        f = np.float32(src - lo)
        P[i, lo] += 1.0 - f
        P[i, hi] += f
    return P


# ----------------------------------------------------------------------------
# in-kernel math helpers
# ----------------------------------------------------------------------------
def _erf_f32(z):
    # Abramowitz & Stegun 7.1.26 rational approximation, |err| < 1.5e-7;
    # avoids relying on an erf lowering inside Mosaic.
    a1, a2, a3, a4, a5 = (0.254829592, -0.284496736, 1.421413741,
                          -1.453152027, 1.061405429)
    p = 0.3275911
    sgn = jnp.where(z >= 0.0, 1.0, -1.0)
    az = jnp.abs(z)
    t = 1.0 / (1.0 + p * az)
    poly = ((((a5 * t + a4) * t + a3) * t + a2) * t + a1) * t
    return sgn * (1.0 - poly * jnp.exp(-az * az))


def _gelu_exact(x):
    return 0.5 * x * (1.0 + _erf_f32(x * 0.7071067811865476))


def _shift_time(x, direction, t_out):
    """x shifted by one step along the (lane) time axis, zero boundary.

    direction=+1 yields x[..., t-1]; direction=-1 yields x[..., t+1]."""
    axis = x.ndim - 1
    if t_out % 128 == 0:
        # lane-multiple case: XLU roll (separate VLIW slot) + boundary mask
        col = jax.lax.broadcasted_iota(jnp.int32, x.shape, axis)
        if direction > 0:
            return jnp.where(col == 0, 0.0, pltpu.roll(x, shift=1, axis=axis))
        return jnp.where(col == t_out - 1, 0.0,
                         pltpu.roll(x, shift=t_out - 1, axis=axis))
    zero = jnp.zeros(x.shape[:-1] + (1,), x.dtype)
    if direction > 0:
        return jnp.concatenate([zero, x[..., : t_out - 1]], axis=axis)
    return jnp.concatenate([x[..., 1:], zero], axis=axis)


# ----------------------------------------------------------------------------
# stage 1: per-sample resample + 3-tap conv (pre-BN) + BN partial sums
# ----------------------------------------------------------------------------
def _stage1_kernel(x_ref, pT_ref, w_ref, conv_ref, pooled_ref, stat_ref, *,
                   block_n, t_out):
    pT = pT_ref[...]                    # (T_in, T_out) bf16
    w_m1 = w_ref[0]                     # (C_out, C_in) bf16, tap x[t-1]
    w_0 = w_ref[1]                      # tap x[t]
    w_p1 = w_ref[2]                     # tap x[t+1]
    c_out = w_0.shape[0]

    s = jnp.zeros((c_out, 1), jnp.float32)
    s2 = jnp.zeros((c_out, 1), jnp.float32)

    for b in range(block_n):            # static, small unrolled loop
        xb = x_ref[b].astype(jnp.bfloat16)                    # (C_in, T_in)
        # AdaptiveAvgPool1d / linear Upsample: one bf16 MXU dot, f32 accumulate
        pooled = jnp.dot(xb, pT, preferred_element_type=jnp.float32)
        #                                                       (C_in, T_out)
        tap_m1 = _shift_time(pooled, +1, t_out)                # x[t-1]
        tap_p1 = _shift_time(pooled, -1, t_out)                # x[t+1]

        pooled_bf = pooled.astype(jnp.bfloat16)
        # three accumulating MXU dots (no lane concat / relayout)
        conv = (jnp.dot(w_m1, tap_m1.astype(jnp.bfloat16),
                        preferred_element_type=jnp.float32)
                + jnp.dot(w_0, pooled_bf,
                          preferred_element_type=jnp.float32)
                + jnp.dot(w_p1, tap_p1.astype(jnp.bfloat16),
                          preferred_element_type=jnp.float32))  # (C_out, T_out)
        # conv bias is folded into the stage-2 shift (exactly cancelled by
        # training-mode BatchNorm anyway).

        # BN partial sums from the f32 conv, BEFORE the bf16 storage cast
        s = s + jnp.sum(conv, axis=1, keepdims=True)
        s2 = s2 + jnp.sum(conv * conv, axis=1, keepdims=True)

        conv_ref[b] = conv.astype(jnp.bfloat16)
        pooled_ref[b] = pooled_bf        # residual source, recomputed/reused in stage 2

    # single store for both partial-sum columns
    stat_ref[0] = jnp.concatenate([s, s2], axis=1)             # (C_out, 2)


# ----------------------------------------------------------------------------
# stage 2: folded BatchNorm (scale/shift) + exact GELU + residual add
# ----------------------------------------------------------------------------
def _stage2_kernel(*refs, has_proj, block_n):
    if has_proj:
        conv_ref, pooled_ref, scale_ref, shift_ref, wr_ref, br_ref, o_ref = refs
    else:
        conv_ref, pooled_ref, scale_ref, shift_ref, o_ref = refs

    scale = scale_ref[...]                                      # (C_out, 1) f32
    shift = shift_ref[...]
    y = conv_ref[...].astype(jnp.float32) * scale + shift       # (B, C_out, T_out)
    act = _gelu_exact(y)

    if has_proj:
        wr = wr_ref[...]                                         # (C_out, C_in) bf16
        br = br_ref[...]                                         # (C_out, 1) f32
        for b in range(block_n):
            res = jnp.dot(wr, pooled_ref[b],
                          preferred_element_type=jnp.float32) + br
            o_ref[b] = (act[b] + res).astype(o_ref.dtype)
    else:
        # identity residual: just re-read the bf16 pooled slab
        o_ref[...] = (act + pooled_ref[...].astype(jnp.float32)).astype(o_ref.dtype)


# ----------------------------------------------------------------------------
# wrapper
# ----------------------------------------------------------------------------
def _pick_block_n(n: int, t_out: int) -> int:
    """Samples per grid step: enough per-step work to amortize the ~0.35 us
    pipeline overhead, capped so the unrolled loop stays small, and keeping
    >= 2 grid blocks so v7x's two TensorCores both get fed."""
    b = max(1, min(8, max(1, 256 // max(t_out, 1)), n))
    while b > 1 and -(-n // b) < 2:
        b -= 1
    return b


@functools.partial(
    jax.jit,
    static_argnames=("out_timesteps", "is_decoder", "batch_norm", "eps"))
def residual_conv_block(x, params, out_timesteps, *, is_decoder=False,
                        batch_norm=True, eps=1e-5):
    n, c_in, t_in = x.shape
    c_out = params["conv1_w"].shape[0]
    t_out = int(out_timesteps)
    has_proj = "proj_w" in params

    # per-sample resampling matrix -- O(T_out * T_in), not O((N*T)^2)
    P = (_linear_upsample_matrix if is_decoder
         else _adaptive_avg_pool_matrix)(t_in, t_out)
    pT = jnp.asarray(P.T, jnp.bfloat16)                          # (T_in, T_out)

    # conv weight (C_out, C_in, K) -> (K, C_out, C_in): one slab per tap
    w_taps = jnp.transpose(params["conv1_w"], (2, 0, 1)).astype(jnp.bfloat16)

    block_n = _pick_block_n(n, t_out)
    n_blocks = -(-n // block_n)
    n_pad = n_blocks * block_n
    x_p = x if n_pad == n else jnp.concatenate(
        [x, jnp.zeros((n_pad - n, c_in, t_in), x.dtype)], axis=0)

    cparams = pltpu.CompilerParams(
        dimension_semantics=("parallel",),
        vmem_limit_bytes=48 * 1024 * 1024)

    samp = lambda shape: pl.BlockSpec(shape, lambda i: (i, 0, 0))
    fix2 = lambda shape: pl.BlockSpec(shape, lambda i: (0, 0))
    fix3 = lambda shape: pl.BlockSpec(shape, lambda i: (0, 0, 0))

    conv_bf, pooled_bf, stats = pl.pallas_call(
        functools.partial(_stage1_kernel, block_n=block_n, t_out=t_out),
        grid=(n_blocks,),
        out_shape=(
            jax.ShapeDtypeStruct((n_pad, c_out, t_out), jnp.bfloat16),
            jax.ShapeDtypeStruct((n_pad, c_in, t_out), jnp.bfloat16),
            jax.ShapeDtypeStruct((n_blocks, c_out, 2), jnp.float32),
        ),
        in_specs=[
            samp((block_n, c_in, t_in)),
            fix2((t_in, t_out)),
            fix3((3, c_out, c_in)),
        ],
        out_specs=(
            samp((block_n, c_out, t_out)),
            samp((block_n, c_in, t_out)),
            pl.BlockSpec((1, c_out, 2), lambda i: (i, 0, 0)),
        ),
        compiler_params=cparams,
    )(x_p, pT, w_taps)

    # Fold training-mode BatchNorm (or the conv bias, if BN is disabled) into a
    # per-channel scale & shift.  O(C) glue work only.  Padded samples
    # contribute exactly zero to the sums, so divide by the real count.
    count = float(n * t_out)
    s = jnp.sum(stats, axis=0)                                   # (C_out, 2)
    if batch_norm:
        mu = s[:, 0] / count
        var = jnp.maximum(s[:, 1] / count - mu * mu, 0.0)        # biased variance
        scale = params["bn_gamma"].astype(jnp.float32) * jax.lax.rsqrt(var + eps)
        shift = params["bn_beta"].astype(jnp.float32) - scale * mu
        # conv bias is omitted: under training-mode BN it cancels exactly.
    else:
        scale = jnp.ones((c_out,), jnp.float32)
        shift = params["conv1_b"].astype(jnp.float32)
    scale = scale.reshape(c_out, 1)
    shift = shift.reshape(c_out, 1)

    s2_inputs = [conv_bf, pooled_bf, scale, shift]
    s2_specs = [
        samp((block_n, c_out, t_out)),
        samp((block_n, c_in, t_out)),
        fix2((c_out, 1)),
        fix2((c_out, 1)),
    ]
    if has_proj:
        s2_inputs += [
            params["proj_w"][:, :, 0].astype(jnp.bfloat16),       # (C_out, C_in)
            params["proj_b"].astype(jnp.float32).reshape(c_out, 1),
        ]
        s2_specs += [fix2((c_out, c_in)), fix2((c_out, 1))]

    out_p = pl.pallas_call(
        functools.partial(_stage2_kernel, has_proj=has_proj, block_n=block_n),
        grid=(n_blocks,),
        out_shape=jax.ShapeDtypeStruct((n_pad, c_out, t_out), jnp.float32),
        in_specs=s2_specs,
        out_specs=samp((block_n, c_out, t_out)),
        compiler_params=cparams,
    )(*s2_inputs)

    return out_p if n_pad == n else out_p[:n]                    # (N, C_out, T_out)


# ----------------------------------------------------------------------------
# deterministic parameter init (shapes as in ResidualConvBlock.__init__)
# ----------------------------------------------------------------------------
def init_params(key, c_in, c_out, kernel_size=3):
    ks = jax.random.split(key, 4)
    b1 = 1.0 / np.sqrt(c_in * kernel_size)
    params = {
        "conv1_w": jax.random.uniform(ks[0], (c_out, c_in, kernel_size),
                                      jnp.float32, -b1, b1),
        "conv1_b": jax.random.uniform(ks[1], (c_out,), jnp.float32, -b1, b1),
        "bn_gamma": jnp.ones((c_out,), jnp.float32),
        "bn_beta": jnp.zeros((c_out,), jnp.float32),
    }
    if c_in != c_out:
        b2 = 1.0 / np.sqrt(c_in)
        params["proj_w"] = jax.random.uniform(ks[2], (c_out, c_in, 1),
                                              jnp.float32, -b2, b2)
        params["proj_b"] = jax.random.uniform(ks[3], (c_out,), jnp.float32,
                                              -b2, b2)
    return params


# ----------------------------------------------------------------------------
# pure-JAX reference (for the correctness check only)
# ----------------------------------------------------------------------------
def reference_forward(x, params, t_out, *, is_decoder=False, batch_norm=True,
                      eps=1e-5, bf16_ops=False):
    """With bf16_ops=True the matmul operands AND the stored intermediates
    (pooled / pre-BN conv) are rounded to bfloat16 exactly like the kernel
    does (BN stats from the unrounded f32 conv), so the kernel can be checked
    against it at tight tolerance."""
    r = ((lambda a: a.astype(jnp.bfloat16).astype(jnp.float32)) if bf16_ops
         else (lambda a: a))
    n, c_in, t_in = x.shape
    P = jnp.asarray((_linear_upsample_matrix if is_decoder
                     else _adaptive_avg_pool_matrix)(t_in, t_out))
    pooled = jnp.einsum("it,nct->nci", r(P), r(x))
    pooled_m = r(pooled)                                  # bf16-stored view
    if "proj_w" in params:
        residual = (jnp.einsum("oc,nci->noi",
                               r(params["proj_w"][:, :, 0]), pooled_m)
                    + params["proj_b"][None, :, None])
    else:
        residual = pooled_m
    conv = jax.lax.conv_general_dilated(
        pooled_m, r(params["conv1_w"]), window_strides=(1,), padding="SAME",
        dimension_numbers=("NCH", "OIH", "NCH"))          # no bias (folded)
    if batch_norm:
        mu = jnp.mean(conv, axis=(0, 2), keepdims=True)   # stats from f32 conv
        var = jnp.mean((conv - mu) ** 2, axis=(0, 2), keepdims=True)
        y = (params["bn_gamma"][None, :, None] * (r(conv) - mu)
             * jax.lax.rsqrt(var + eps) + params["bn_beta"][None, :, None])
        # conv bias cancels exactly under training-mode batch statistics
    else:
        y = r(conv) + params["conv1_b"][None, :, None]
    return jax.nn.gelu(y, approximate=False) + residual


if __name__ == "__main__":
    key = jax.random.PRNGKey(0)
    k1, k2, k3, k4 = jax.random.split(key, 4)

    # encoder-style block: adaptive avg-pool 16 -> 8, 4 -> 8 channels (1x1 proj)
    x_enc = jax.random.normal(k1, (2, 4, 16), jnp.float32)
    p_enc = init_params(k2, 4, 8)
    out = jax.block_until_ready(residual_conv_block(x_enc, p_enc, 8))
    assert out.shape == (2, 8, 8), out.shape
    ref_bf = reference_forward(x_enc, p_enc, 8, bf16_ops=True)
    ref_f32 = reference_forward(x_enc, p_enc, 8)
    # tight check vs the bf16-mirrored reference (kernel-logic check)
    np.testing.assert_allclose(np.asarray(out), np.asarray(ref_bf),
                               rtol=2e-3, atol=2e-3)
    # loose check vs the pristine f32 reference (bounds bf16 quantization)
    np.testing.assert_allclose(np.asarray(out), np.asarray(ref_f32),
                               rtol=5e-2, atol=8e-2)

    # decoder-style block: linear upsample 8 -> 16, identity residual (8 -> 8)
    x_dec = jax.random.normal(k3, (2, 8, 8), jnp.float32)
    p_dec = init_params(k4, 8, 8)
    out_d = jax.block_until_ready(
        residual_conv_block(x_dec, p_dec, 16, is_decoder=True))
    assert out_d.shape == (2, 8, 16), out_d.shape
    ref_d = reference_forward(x_dec, p_dec, 16, is_decoder=True, bf16_ops=True)
    np.testing.assert_allclose(np.asarray(out_d), np.asarray(ref_d),
                               rtol=2e-3, atol=2e-3)

    # batch_norm=False path (conv bias applied via the stage-2 shift)
    out_nb = jax.block_until_ready(
        residual_conv_block(x_enc, p_enc, 8, batch_norm=False))
    ref_nb = reference_forward(x_enc, p_enc, 8, batch_norm=False, bf16_ops=True)
    np.testing.assert_allclose(np.asarray(out_nb), np.asarray(ref_nb),
                               rtol=2e-3, atol=2e-3)

    print("KERNEL_OK")
</pallas_src>

<mosaic_0001>
module attributes {stable_mosaic.version = 11 : i64} {
  func.func @_stage1_kernel(%arg0: i32, %arg1: memref<1x4x16xf32, #tpu.memory_space<vmem>>, %arg2: memref<16x8xbf16, #tpu.memory_space<vmem>>, %arg3: memref<3x8x4xbf16, #tpu.memory_space<vmem>>, %arg4: memref<1x8x8xbf16, #tpu.memory_space<vmem>>, %arg5: memref<1x4x8xbf16, #tpu.memory_space<vmem>>, %arg6: memref<1x8x2xf32, #tpu.memory_space<vmem>>) attributes {dimension_semantics = [#tpu.dimension_semantics<parallel>], iteration_bounds = array<i64: 2>, scalar_prefetch = 0 : i64, scratch_operands = 0 : i64, tpu.core_type = #tpu.core_type<tc>, window_params = [{transform_indices = @transform_0, window_bounds = array<i64: 1, 4, 16>}, {pipeline_mode = #tpu.pipeline_mode<synchronous>, transform_indices = @transform_1, window_bounds = array<i64: 16, 8>}, {pipeline_mode = #tpu.pipeline_mode<synchronous>, transform_indices = @transform_2, window_bounds = array<i64: 3, 8, 4>}, {transform_indices = @transform_3, window_bounds = array<i64: 1, 8, 8>}, {transform_indices = @transform_4, window_bounds = array<i64: 1, 4, 8>}, {transform_indices = @transform_5, window_bounds = array<i64: 1, 8, 2>}]} {
    %c0 = arith.constant 0 : index
    %c0_0 = arith.constant 0 : index
    %0 = vector.load %arg2[%c0, %c0_0] : memref<16x8xbf16, #tpu.memory_space<vmem>>, vector<16x8xbf16>
    %c0_1 = arith.constant 0 : index
    %c0_2 = arith.constant 0 : index
    %c0_3 = arith.constant 0 : index
    %1 = vector.load %arg3[%c0_1, %c0_2, %c0_3] : memref<3x8x4xbf16, #tpu.memory_space<vmem>>, vector<1x8x4xbf16>
    %2 = vector.shape_cast %1 : vector<1x8x4xbf16> to vector<8x4xbf16>
    %c1 = arith.constant 1 : index
    %c0_4 = arith.constant 0 : index
    %c0_5 = arith.constant 0 : index
    %3 = vector.load %arg3[%c1, %c0_4, %c0_5] : memref<3x8x4xbf16, #tpu.memory_space<vmem>>, vector<1x8x4xbf16>
    %4 = vector.shape_cast %3 : vector<1x8x4xbf16> to vector<8x4xbf16>
    %c2 = arith.constant 2 : index
    %c0_6 = arith.constant 0 : index
    %c0_7 = arith.constant 0 : index
    %5 = vector.load %arg3[%c2, %c0_6, %c0_7] : memref<3x8x4xbf16, #tpu.memory_space<vmem>>, vector<1x8x4xbf16>
    %6 = vector.shape_cast %5 : vector<1x8x4xbf16> to vector<8x4xbf16>
    %cst = arith.constant 0.000000e+00 : f32
    %7 = vector.broadcast %cst : f32 to vector<8x1xf32>
    %cst_8 = arith.constant 0.000000e+00 : f32
    %8 = vector.broadcast %cst_8 : f32 to vector<8x1xf32>
    %c0_9 = arith.constant 0 : index
    %c0_10 = arith.constant 0 : index
    %c0_11 = arith.constant 0 : index
    %9 = vector.load %arg1[%c0_9, %c0_10, %c0_11] : memref<1x4x16xf32, #tpu.memory_space<vmem>>, vector<1x4x16xf32>
    %10 = vector.shape_cast %9 : vector<1x4x16xf32> to vector<4x16xf32>
    %11 = arith.truncf %10 : vector<4x16xf32> to vector<4x16xbf16>
    %cst_12 = arith.constant dense<0.000000e+00> : vector<4x8xf32>
    %12 = tpu.matmul %11, %0, %cst_12 {dimension_numbers = #tpu.dot_dimension_numbers<[1], [0], [0], [1], [0, 0, 1, 1], [], []>} : vector<4x16xbf16>, vector<16x8xbf16>, vector<4x8xf32> -> vector<4x8xf32>
    %cst_13 = arith.constant 0.000000e+00 : f32
    %13 = vector.broadcast %cst_13 : f32 to vector<4x1xf32>
    %14 = vector.extract_strided_slice %12 {offsets = [0, 0], sizes = [4, 7], strides = [1, 1]} : vector<4x8xf32> to vector<4x7xf32>
    %15 = tpu.concatenate %13, %14 in 1 : vector<4x1xf32>, vector<4x7xf32> -> vector<4x8xf32>
    %cst_14 = arith.constant 0.000000e+00 : f32
    %16 = vector.broadcast %cst_14 : f32 to vector<4x1xf32>
    %17 = vector.extract_strided_slice %12 {offsets = [0, 1], sizes = [4, 7], strides = [1, 1]} : vector<4x8xf32> to vector<4x7xf32>
    %18 = tpu.concatenate %17, %16 in 1 : vector<4x7xf32>, vector<4x1xf32> -> vector<4x8xf32>
    %19 = arith.truncf %12 : vector<4x8xf32> to vector<4x8xbf16>
    %20 = arith.truncf %15 : vector<4x8xf32> to vector<4x8xbf16>
    %cst_15 = arith.constant dense<0.000000e+00> : vector<8x8xf32>
    %21 = tpu.matmul %2, %20, %cst_15 {dimension_numbers = #tpu.dot_dimension_numbers<[1], [0], [0], [1], [0, 0, 1, 1], [], []>} : vector<8x4xbf16>, vector<4x8xbf16>, vector<8x8xf32> -> vector<8x8xf32>
    %cst_16 = arith.constant dense<0.000000e+00> : vector<8x8xf32>
    %22 = tpu.matmul %4, %19, %cst_16 {dimension_numbers = #tpu.dot_dimension_numbers<[1], [0], [0], [1], [0, 0, 1, 1], [], []>} : vector<8x4xbf16>, vector<4x8xbf16>, vector<8x8xf32> -> vector<8x8xf32>
    %23 = arith.addf %21, %22 : vector<8x8xf32>
    %24 = arith.truncf %18 : vector<4x8xf32> to vector<4x8xbf16>
    %cst_17 = arith.constant dense<0.000000e+00> : vector<8x8xf32>
    %25 = tpu.matmul %6, %24, %cst_17 {dimension_numbers = #tpu.dot_dimension_numbers<[1], [0], [0], [1], [0, 0, 1, 1], [], []>} : vector<8x4xbf16>, vector<4x8xbf16>, vector<8x8xf32> -> vector<8x8xf32>
    %26 = arith.addf %23, %25 : vector<8x8xf32>
    %cst_18 = arith.constant dense<0.000000e+00> : vector<8xf32>
    %27 = vector.multi_reduction <add>, %26, %cst_18 [1] : vector<8x8xf32> to vector<8xf32>
    %28 = vector.shape_cast %27 : vector<8xf32> to vector<8x1xf32>
    %29 = arith.addf %7, %28 : vector<8x1xf32>
    %30 = arith.mulf %26, %26 : vector<8x8xf32>
    %cst_19 = arith.constant dense<0.000000e+00> : vector<8xf32>
    %31 = vector.multi_reduction <add>, %30, %cst_19 [1] : vector<8x8xf32> to vector<8xf32>
    %32 = vector.shape_cast %31 : vector<8xf32> to vector<8x1xf32>
    %33 = arith.addf %8, %32 : vector<8x1xf32>
    %34 = arith.truncf %26 : vector<8x8xf32> to vector<8x8xbf16>
    %c0_20 = arith.constant 0 : index
    %c0_21 = arith.constant 0 : index
    %c0_22 = arith.constant 0 : index
    %35 = vector.load %arg4[%c0_20, %c0_21, %c0_22] : memref<1x8x8xbf16, #tpu.memory_space<vmem>>, vector<1x8x8xbf16>
    %36 = vector.shape_cast %35 : vector<1x8x8xbf16> to vector<8x8xbf16>
    %37 = vector.shape_cast %34 : vector<8x8xbf16> to vector<1x8x8xbf16>
    tpu.vector_store %arg4[%c0_20, %c0_21, %c0_22], %37 {strides = array<i32>} : memref<1x8x8xbf16, #tpu.memory_space<vmem>>, vector<1x8x8xbf16>,
    %c0_23 = arith.constant 0 : index
    %c0_24 = arith.constant 0 : index
    %c0_25 = arith.constant 0 : index
    %38 = vector.load %arg5[%c0_23, %c0_24, %c0_25] : memref<1x4x8xbf16, #tpu.memory_space<vmem>>, vector<1x4x8xbf16>
    %39 = vector.shape_cast %38 : vector<1x4x8xbf16> to vector<4x8xbf16>
    %40 = vector.shape_cast %19 : vector<4x8xbf16> to vector<1x4x8xbf16>
    tpu.vector_store %arg5[%c0_23, %c0_24, %c0_25], %40 {strides = array<i32>} : memref<1x4x8xbf16, #tpu.memory_space<vmem>>, vector<1x4x8xbf16>,
    %41 = tpu.concatenate %29, %33 in 1 : vector<8x1xf32>, vector<8x1xf32> -> vector<8x2xf32>
    %c0_26 = arith.constant 0 : index
    %c0_27 = arith.constant 0 : index
    %c0_28 = arith.constant 0 : index
    %42 = vector.load %arg6[%c0_26, %c0_27, %c0_28] : memref<1x8x2xf32, #tpu.memory_space<vmem>>, vector<1x8x2xf32>
    %43 = vector.shape_cast %42 : vector<1x8x2xf32> to vector<8x2xf32>
    %44 = vector.shape_cast %41 : vector<8x2xf32> to vector<1x8x2xf32>
    tpu.vector_store %arg6[%c0_26, %c0_27, %c0_28], %44 {strides = array<i32>} : memref<1x8x2xf32, #tpu.memory_space<vmem>>, vector<1x8x2xf32>,
    return
  }
  func.func @transform_0(%arg0: i32) -> (i32, i32, i32) {
    %c0_i32 = arith.constant 0 : i32
    %c0_i32_0 = arith.constant 0 : i32
    %c0_i32_1 = arith.constant 0 : i32
    return %arg0, %c0_i32, %c0_i32_0 : i32, i32, i32
  }
  func.func @transform_1(%arg0: i32) -> (i32, i32) {
    %c0_i32 = arith.constant 0 : i32
    %c0_i32_0 = arith.constant 0 : i32
    %c0_i32_1 = arith.constant 0 : i32
    return %c0_i32, %c0_i32_0 : i32, i32
  }
  func.func @transform_2(%arg0: i32) -> (i32, i32, i32) {
    %c0_i32 = arith.constant 0 : i32
    %c0_i32_0 = arith.constant 0 : i32
    %c0_i32_1 = arith.constant 0 : i32
    %c0_i32_2 = arith.constant 0 : i32
    return %c0_i32, %c0_i32_0, %c0_i32_1 : i32, i32, i32
  }
  func.func @transform_3(%arg0: i32) -> (i32, i32, i32) {
    %c0_i32 = arith.constant 0 : i32
    %c0_i32_0 = arith.constant 0 : i32
    %c0_i32_1 = arith.constant 0 : i32
    return %arg0, %c0_i32, %c0_i32_0 : i32, i32, i32
  }
  func.func @transform_4(%arg0: i32) -> (i32, i32, i32) {
    %c0_i32 = arith.constant 0 : i32
    %c0_i32_0 = arith.constant 0 : i32
    %c0_i32_1 = arith.constant 0 : i32
    return %arg0, %c0_i32, %c0_i32_0 : i32, i32, i32
  }
  func.func @transform_5(%arg0: i32) -> (i32, i32, i32) {
    %c0_i32 = arith.constant 0 : i32
    %c0_i32_0 = arith.constant 0 : i32
    %c0_i32_1 = arith.constant 0 : i32
    return %arg0, %c0_i32, %c0_i32_0 : i32, i32, i32
  }
}

module attributes {stable_mosaic.version = 11 : i64} {
  func.func @_stage2_kernel(%arg0: i32, %arg1: memref<1x8x8xbf16, #tpu.memory_space<vmem>>, %arg2: memref<1x4x8xbf16, #tpu.memory_space<vmem>>, %arg3: memref<8x1xf32, #tpu.memory_space<vmem>>, %arg4: memref<8x1xf32, #tpu.memory_space<vmem>>, %arg5: memref<8x4xbf16, #tpu.memory_space<vmem>>, %arg6: memref<8x1xf32, #tpu.memory_space<vmem>>, %arg7: memref<1x8x8xf32, #tpu.memory_space<vmem>>) attributes {dimension_semantics = [#tpu.dimension_semantics<parallel>], iteration_bounds = array<i64: 2>, scalar_prefetch = 0 : i64, scratch_operands = 0 : i64, tpu.core_type = #tpu.core_type<tc>, window_params = [{transform_indices = @transform_0, window_bounds = array<i64: 1, 8, 8>}, {transform_indices = @transform_1, window_bounds = array<i64: 1, 4, 8>}, {pipeline_mode = #tpu.pipeline_mode<synchronous>, transform_indices = @transform_2, window_bounds = array<i64: 8, 1>}, {pipeline_mode = #tpu.pipeline_mode<synchronous>, transform_indices = @transform_3, window_bounds = array<i64: 8, 1>}, {pipeline_mode = #tpu.pipeline_mode<synchronous>, transform_indices = @transform_4, window_bounds = array<i64: 8, 4>}, {pipeline_mode = #tpu.pipeline_mode<synchronous>, transform_indices = @transform_5, window_bounds = array<i64: 8, 1>}, {transform_indices = @transform_6, window_bounds = array<i64: 1, 8, 8>}]} {
    %c0 = arith.constant 0 : index
    %c0_0 = arith.constant 0 : index
    %0 = vector.load %arg3[%c0, %c0_0] : memref<8x1xf32, #tpu.memory_space<vmem>>, vector<8x1xf32>
    %c0_1 = arith.constant 0 : index
    %c0_2 = arith.constant 0 : index
    %1 = vector.load %arg4[%c0_1, %c0_2] : memref<8x1xf32, #tpu.memory_space<vmem>>, vector<8x1xf32>
    %c0_3 = arith.constant 0 : index
    %c0_4 = arith.constant 0 : index
    %c0_5 = arith.constant 0 : index
    %2 = vector.load %arg1[%c0_3, %c0_4, %c0_5] : memref<1x8x8xbf16, #tpu.memory_space<vmem>>, vector<1x8x8xbf16>
    %3 = arith.extf %2 : vector<1x8x8xbf16> to vector<1x8x8xf32>
    %4 = vector.shape_cast %0 : vector<8x1xf32> to vector<1x8x1xf32>
    %5 = vector.broadcast %4 : vector<1x8x1xf32> to vector<1x8x8xf32>
    %6 = arith.mulf %3, %5 : vector<1x8x8xf32>
    %7 = vector.shape_cast %1 : vector<8x1xf32> to vector<1x8x1xf32>
    %8 = vector.broadcast %7 : vector<1x8x1xf32> to vector<1x8x8xf32>
    %9 = arith.addf %6, %8 : vector<1x8x8xf32>
    %cst = arith.constant 5.000000e-01 : f32
    %10 = vector.broadcast %cst : f32 to vector<1x8x8xf32>
    %11 = arith.mulf %10, %9 : vector<1x8x8xf32>
    %cst_6 = arith.constant 0.707106769 : f32
    %12 = vector.broadcast %cst_6 : f32 to vector<1x8x8xf32>
    %13 = arith.mulf %9, %12 : vector<1x8x8xf32>
    %cst_7 = arith.constant 0.000000e+00 : f32
    %14 = vector.broadcast %cst_7 : f32 to vector<1x8x8xf32>
    %15 = arith.cmpf oge, %13, %14 : vector<1x8x8xf32>
    %cst_8 = arith.constant 1.000000e+00 : f32
    %cst_9 = arith.constant -1.000000e+00 : f32
    %16 = vector.broadcast %cst_8 : f32 to vector<1x8x8xf32>
    %17 = vector.broadcast %cst_9 : f32 to vector<1x8x8xf32>
    %18 = arith.select %15, %16, %17 : vector<1x8x8xi1>, vector<1x8x8xf32>
    %19 = math.absf %13 : vector<1x8x8xf32>
    %cst_10 = arith.constant 0.327591091 : f32
    %20 = vector.broadcast %cst_10 : f32 to vector<1x8x8xf32>
    %21 = arith.mulf %20, %19 : vector<1x8x8xf32>
    %cst_11 = arith.constant 1.000000e+00 : f32
    %22 = vector.broadcast %cst_11 : f32 to vector<1x8x8xf32>
    %23 = arith.addf %22, %21 : vector<1x8x8xf32>
    %cst_12 = arith.constant 1.000000e+00 : f32
    %24 = vector.broadcast %cst_12 : f32 to vector<1x8x8xf32>
    %25 = arith.divf %24, %23 : vector<1x8x8xf32>
    %cst_13 = arith.constant 1.06140542 : f32
    %26 = vector.broadcast %cst_13 : f32 to vector<1x8x8xf32>
    %27 = arith.mulf %26, %25 : vector<1x8x8xf32>
    %cst_14 = arith.constant -1.45315206 : f32
    %28 = vector.broadcast %cst_14 : f32 to vector<1x8x8xf32>
    %29 = arith.addf %27, %28 : vector<1x8x8xf32>
    %30 = arith.mulf %29, %25 : vector<1x8x8xf32>
    %cst_15 = arith.constant 1.42141378 : f32
    %31 = vector.broadcast %cst_15 : f32 to vector<1x8x8xf32>
    %32 = arith.addf %30, %31 : vector<1x8x8xf32>
    %33 = arith.mulf %32, %25 : vector<1x8x8xf32>
    %cst_16 = arith.constant -0.284496725 : f32
    %34 = vector.broadcast %cst_16 : f32 to vector<1x8x8xf32>
    %35 = arith.addf %33, %34 : vector<1x8x8xf32>
    %36 = arith.mulf %35, %25 : vector<1x8x8xf32>
    %cst_17 = arith.constant 0.254829586 : f32
    %37 = vector.broadcast %cst_17 : f32 to vector<1x8x8xf32>
    %38 = arith.addf %36, %37 : vector<1x8x8xf32>
    %39 = arith.mulf %38, %25 : vector<1x8x8xf32>
    %cst_18 = arith.constant 0.000000e+00 : f32
    %40 = vector.broadcast %cst_18 : f32 to vector<1x8x8xf32>
    %41 = arith.subf %40, %19 : vector<1x8x8xf32>
    %42 = arith.mulf %41, %19 : vector<1x8x8xf32>
    %43 = math.exp %42 : vector<1x8x8xf32>
    %44 = arith.mulf %39, %43 : vector<1x8x8xf32>
    %cst_19 = arith.constant 1.000000e+00 : f32
    %45 = vector.broadcast %cst_19 : f32 to vector<1x8x8xf32>
    %46 = arith.subf %45, %44 : vector<1x8x8xf32>
    %47 = arith.mulf %18, %46 : vector<1x8x8xf32>
    %cst_20 = arith.constant 1.000000e+00 : f32
    %48 = vector.broadcast %cst_20 : f32 to vector<1x8x8xf32>
    %49 = arith.addf %48, %47 : vector<1x8x8xf32>
    %50 = arith.mulf %11, %49 : vector<1x8x8xf32>
    %c0_21 = arith.constant 0 : index
    %c0_22 = arith.constant 0 : index
    %51 = vector.load %arg5[%c0_21, %c0_22] : memref<8x4xbf16, #tpu.memory_space<vmem>>, vector<8x4xbf16>
    %c0_23 = arith.constant 0 : index
    %c0_24 = arith.constant 0 : index
    %52 = vector.load %arg6[%c0_23, %c0_24] : memref<8x1xf32, #tpu.memory_space<vmem>>, vector<8x1xf32>
    %c0_25 = arith.constant 0 : index
    %c0_26 = arith.constant 0 : index
    %c0_27 = arith.constant 0 : index
    %53 = vector.load %arg2[%c0_25, %c0_26, %c0_27] : memref<1x4x8xbf16, #tpu.memory_space<vmem>>, vector<1x4x8xbf16>
    %54 = vector.shape_cast %53 : vector<1x4x8xbf16> to vector<4x8xbf16>
    %cst_28 = arith.constant dense<0.000000e+00> : vector<8x8xf32>
    %55 = tpu.matmul %51, %54, %cst_28 {dimension_numbers = #tpu.dot_dimension_numbers<[1], [0], [0], [1], [0, 0, 1, 1], [], []>} : vector<8x4xbf16>, vector<4x8xbf16>, vector<8x8xf32> -> vector<8x8xf32>
    %56 = vector.broadcast %52 : vector<8x1xf32> to vector<8x8xf32>
    %57 = arith.addf %55, %56 : vector<8x8xf32>
    %58 = vector.shape_cast %50 : vector<1x8x8xf32> to vector<8x8xf32>
    %59 = arith.addf %58, %57 : vector<8x8xf32>
    %c0_29 = arith.constant 0 : index
    %c0_30 = arith.constant 0 : index
    %c0_31 = arith.constant 0 : index
    %60 = vector.load %arg7[%c0_29, %c0_30, %c0_31] : memref<1x8x8xf32, #tpu.memory_space<vmem>>, vector<1x8x8xf32>
    %61 = vector.shape_cast %60 : vector<1x8x8xf32> to vector<8x8xf32>
    %62 = vector.shape_cast %59 : vector<8x8xf32> to vector<1x8x8xf32>
    tpu.vector_store %arg7[%c0_29, %c0_30, %c0_31], %62 {strides = array<i32>} : memref<1x8x8xf32, #tpu.memory_space<vmem>>, vector<1x8x8xf32>,
    return
  }
  func.func @transform_0(%arg0: i32) -> (i32, i32, i32) {
    %c0_i32 = arith.constant 0 : i32
    %c0_i32_0 = arith.constant 0 : i32
    %c0_i32_1 = arith.constant 0 : i32
    return %arg0, %c0_i32, %c0_i32_0 : i32, i32, i32
  }
  func.func @transform_1(%arg0: i32) -> (i32, i32, i32) {
    %c0_i32 = arith.constant 0 : i32
    %c0_i32_0 = arith.constant 0 : i32
    %c0_i32_1 = arith.constant 0 : i32
    return %arg0, %c0_i32, %c0_i32_0 : i32, i32, i32
  }
  func.func @transform_2(%arg0: i32) -> (i32, i32) {
    %c0_i32 = arith.constant 0 : i32
    %c0_i32_0 = arith.constant 0 : i32
    %c0_i32_1 = arith.constant 0 : i32
    return %c0_i32, %c0_i32_0 : i32, i32
  }
  func.func @transform_3(%arg0: i32) -> (i32, i32) {
    %c0_i32 = arith.constant 0 : i32
    %c0_i32_0 = arith.constant 0 : i32
    %c0_i32_1 = arith.constant 0 : i32
    return %c0_i32, %c0_i32_0 : i32, i32
  }
  func.func @transform_4(%arg0: i32) -> (i32, i32) {
    %c0_i32 = arith.constant 0 : i32
    %c0_i32_0 = arith.constant 0 : i32
    %c0_i32_1 = arith.constant 0 : i32
    return %c0_i32, %c0_i32_0 : i32, i32
  }
  func.func @transform_5(%arg0: i32) -> (i32, i32) {
    %c0_i32 = arith.constant 0 : i32
    %c0_i32_0 = arith.constant 0 : i32
    %c0_i32_1 = arith.constant 0 : i32
    return %c0_i32, %c0_i32_0 : i32, i32
  }
  func.func @transform_6(%arg0: i32) -> (i32, i32, i32) {
    %c0_i32 = arith.constant 0 : i32
    %c0_i32_0 = arith.constant 0 : i32
    %c0_i32_1 = arith.constant 0 : i32
    return %arg0, %c0_i32, %c0_i32_0 : i32, i32, i32
  }
}

</mosaic_0001>

<bundles_post_ra>
// kernel: residual_conv_block.3
= control target key start
LH: loop header
LB: loop body
LE: loop exit
PB: predicated region body
PF: predicated region fallthrough
CT: control target
= control target key end

     0   :  { %11 = vsyncpa [#allocation3], 0  ;;  %s740_s0 = inlined_call_operand.vmem [shape: bf16[2,8,8], index: 0, kind: input, shape index: {}]   ;;  %s741_s1 = inlined_call_operand.vmem [shape: bf16[2,4,8], index: 1, kind: input, shape index: {}]   ;;  %s742_s2 = inlined_call_operand.vmem [shape: f32[8,1], index: 2, kind: input, shape index: {}]   ;;  %s743_s3 = inlined_call_operand.vmem [shape: f32[8,1], index: 3, kind: input, shape index: {}]   ;;  %s744_s4 = inlined_call_operand.vmem [shape: bf16[8,4], index: 4, kind: input, shape index: {}]   ;;  %s745_s5 = inlined_call_operand.vmem [shape: f32[8,1], index: 5, kind: input, shape index: {}]   ;;  %s746_s6 = inlined_call_operand.hbm [shape: f32[2,8,8], index: 6, kind: output, shape index: {}]  }
   0x1   :  { %13 = vsyncpa [#allocation3 + $0x1], 0  ;;  %s625_s21 = smov 0   ;;  %s627_s22 = smov 0  }
   0x2   :  { %s629_s23 = smov 0   ;;  %s631_s24 = smov 0  }
   0x3 LB: > { %s646_s25 = sadd.s32 4294967295, %s583_s24   ;;  %s452_s26 = sadd.s32 4294967294, %s583_s24   ;;  %s583_s24 = sphi %s631_s24, %s752_s24   ;;  %s579_s23 = sphi %s629_s23, %s751_s23   ;;  %s575_s22 = sphi %s627_s22, %s750_s22   ;;  %s571_s21 = sphi %s625_s21, %s749_s21  }
   0x4   : > { %s650_s27 = sadd.s32 1, %s583_s24   ;;  %s162_s28 = sadd.s32 1, %s579_s23 }
   0x5   : > { %s159_s29 = ssub.s32 %s583_s24, %s650_s27  ;;  %p172_p0 = scmp.ne.s32.totalorder %s579_s23, %s575_s22 }
   0x6   : > { %p160_p1 = scmp.eq.s32.totalorder %s159_s29, 0  ;;  %p173_p2 = scmp.eq.s32.totalorder %s646_s25, 1 }
   0x7   : > { %p178_p3 = scmp.ne.s32.totalorder %s575_s22, %s571_s21  ;;  %p179_p4 = scmp.eq.s32.totalorder %s452_s26, 1 }
   0x8   : > { %s661_s30 = scalar_select %p160_p1, %s579_s23, %s162_s28  }
   0x9   : > { %p663_p5 = por %p173_p2, %p172_p0  ;;  %p667_p6 = por %p179_p4, %p178_p3 }
   0xa   : > { %p455_p7 = scmp.ge.s32.totalorder %s583_s24, 1  ;;  %p223_p8 = scmp.lt.s32.totalorder %s583_s24, 3 }
   0xc   : > { %p224_p9 = pnand %p455_p7, %p223_p8 }
   0xd   : > { %v265_v0 = vld [vmem:[%s742_s2] sm:$0xff] (!%p224_p9)  ;;  %p256_p10 = scmp.lt.s32.totalorder (!%p224_p9), %s646_s25, 1  ;;  %v585_v1 = vmov (!%p224_p9), 0   ;;  %v586_v2 = vmov (!%p224_p9), 0.0   ;;  %vm587_vm0 = vmmov (!%p224_p9), 0   ;;  %vm320_vm1 = vcmask (!%p224_p9), 1041408  }
   0xe   : > { %227 = sbr.rel (%p224_p9) target bundleno = 260 (0x104), region = 44  ;;  %515 = vset.pattern.permute.xlu0 (!%p224_p9), %v585_v1  ;;  %466 = vmatprep.subr.bf16.mxu0 (!%p224_p9), %v586_v2  ;;  %v309_v3 = vld [vmem:[%s745_s5] sm:$0xff] (!%p224_p9)  ;;  %vm316_vm2 = vcmask (!%p224_p9), 31744   ;;  %v588_v34 = vmov (!%p224_p9), -1.0   ;;  %s253_s11 = sand.u32 (!%p224_p9), 1, %s575_s22   ;;  %vm365_vm4 = vcmask (!%p224_p9), 64512  }
   0xf   : > { %271 = vperm.xlu0 (!%p224_p9), %515, %v265_v0   ;;  %468 = vmatprep.mubr.msk.bf16.mxu0 (!%p224_p9), %vm587_vm0, %v586_v2  ;;  %v266_v4 = vld [vmem:[%s743_s3] sm:$0xff] (!%p224_p9)  ;;  %s456_s12 = sshll.u32 (!%p224_p9), %s253_s11, 3  ;;  %s589_s20 = smov (!%p224_p9), [#allocation2]  }
  0x10   : > { %516 = vset.pattern.permute.xlu1 (!%p224_p9), %v585_v1  ;;  %v308_v7 = vld [vmem:[%s744_s4] sm:$0xf] (!%p224_p9)  ;;  %s255_s14 = scalar_lea.vmem (!%p224_p9), [#allocation2], %s456_s12  ;;  %s525_s26 = sshll.u32 (!%p224_p9), %s589_s20, 4  ;;  %s526_s26 = int_to_ptr.vmem [resolvable:$false] %s525_s26 }
  0x11   : > { %313 = vperm.xlu1 (!%p224_p9), %516, %v309_v3   ;;  %s381_s15 = sshll.u32 (!%p224_p9), %s255_s14, 4  ;;  %s700_s15 = int_to_ptr.vmem [resolvable:$true] %s381_s15 }
  0x12   : > { %p528_p0 = scmp.lt.s32.totalorder (!%p224_p9), %s700_s15, %s526_s26 }
  0x13   : > { %277 = vperm.xlu0 (!%p224_p9), %515, %v266_v4  }
  0x15   : > { %s257_s13 = scalar_select %p256_p10, %s646_s25, 1 }
  0x17   : > { %s458_s16 = sshll.u32 %s257_s13, 1  ;;  %s457_s28 = sshll.u32 %s257_s13, 2 }
  0x18   : > { %s263_s19 = scalar_lea.vmem %s741_s1, %s458_s16  ;;  %s259_s10 = scalar_lea.vmem %s740_s0, %s457_s28 }
  0x19   : > { %v310_v5 = vld [vmem:[%s263_s19] sm:$0x3]  ;;  %s461_s13 = sshll.u32 %s646_s25, 7  ;;  %s368_s25 = scalar_lea.sflag [#allocation3], %s253_s11 }
  0x1a   : > { %v322_v6 = vsel %vm320_vm1, %v310_v5, 0  ;;  %v267_v8 = vld [vmem:[%s259_s10] sm:$0xf]  ;;  %s698_s18 = scalar_lea.hbm %s746_s6, %s461_s13  ;;  %s521_s19 = scalar_lea.vmem %s700_s15, 128 }
  0x1b   : > { %467 = vmatpush3.bf16.msra.mxu0 %v322_v6  ;;  %v268_v10 = vunpack.c.l.bf16 %v267_v8  ;;  %p522_p11 = scmp.ne.s32.totalorder %s700_s15, %s521_s19  ;;  %s527_s28 = scalar_lea.vmem %s526_s26, 256 }
  0x1c   : > { %p529_p1 = scmp.lt.s32.totalorder %s527_s28, %s521_s19 }
  0x1d   : > { %p523_p12 = pnand %p522_p11, %p663_p5 }
  0x1e   : > { %469 = vmatmul.mubr.msk.bf16.vlgmr.msra.gmra.mrb[0].mxu0 %vm316_vm2, %v308_v7  ;;  %p530_p2 = por %p529_p1, %p528_p0 }
  0x1f   : > { %p524_p13 = pneg %p523_p12 }
  0x21   : > { %p531_p3 = pnand %p530_p2, %p524_p13 }
  0x8e   : > { %v272_v9 = vpop.permute.xlu0 %271 }
  0x8f   : > { %v274_v11 = vmul.f32 %v272_v9, %v268_v10 }
  0x90   : > { %v314_v38 = vpop.permute.xlu1 %313 }
  0x92   : > { %v278_v12 = vpop.permute.xlu0 %277 }
  0x93   : > { %v280_v13 = vadd.f32 %v278_v12, %v274_v11 }
  0x95   : > { %v282_v14 = vmul.f32 0.70710677, %v280_v13  ;;  %v281_v39 = vmul.f32 0.5, %v280_v13 }
  0x97   : > { %v285_v15 = vand.u32 2147483647, %v282_v14  ;;  %vm283_vm3 = vcmp.ge.f32.partialorder %v282_v14, 0.0 }
  0x98   : > { %v284_v35 = vsel %vm283_vm3, 1.0, %v588_v34 }
  0x99   : > { %v286_v16 = vmul.f32 0.3275911, %v285_v15  ;;  %v299_v22 = vsub.f32 0.0, %v285_v15 }
  0x9b   : > { %v287_v17 = vadd.f32 1.0, %v286_v16  ;;  %v300_v24 = vmul.f32 %v299_v22, %v285_v15 }
  0x9d   : > { %517 = vrcp.f32 %v287_v17  ;;  %v301_v26 = vmul.f32 1.442695, %v300_v24 }
  0x9f   : > { %519 = vpow2.f32 %v301_v26 }
  0xa7   : > { %v518_v18 = vpop.eup %517 }
  0xa8   : > { %v290_v19 = vmul.f32 1.0614054, %v518_v18 }
  0xa9   : > { %v520_v31 = vpop.eup %519 }
  0xaa   : > { %v291_v20 = vadd.f32 -1.4531521, %v290_v19 }
  0xac   : > { %v292_v21 = vmul.f32 %v518_v18, %v291_v20 }
  0xae   : > { %v293_v23 = vadd.f32 1.4214138, %v292_v21 }
  0xb0   : > { %v294_v25 = vmul.f32 %v518_v18, %v293_v23 }
  0xb2   : > { %v295_v27 = vadd.f32 -0.28449672, %v294_v25 }
  0xb4   : > { %v296_v28 = vmul.f32 %v518_v18, %v295_v27 }
  0xb6   : > { %v297_v29 = vadd.f32 0.2548296, %v296_v28 }
  0xb8   : > { %v298_v30 = vmul.f32 %v518_v18, %v297_v29 }
  0xba   : > { %v303_v32 = vmul.f32 %v520_v31, %v298_v30 }
  0xbc   : > { %v304_v33 = vsub.f32 1.0, %v303_v32 }
  0xbe   : > { %v305_v36 = vmul.f32 %v304_v33, %v284_v35 }
  0xc0   : > { %v306_v37 = vadd.f32 1.0, %v305_v36 }
  0xc2   : > { %v307_v41 = vmul.f32 %v306_v37, %v281_v39 }
  0xf1   : > { %v358_v40 = vpop.f32.mrb[0].mxu0 }
  0xf2   : > { %v359_v42 = vadd.f32 %v358_v40, %v314_v38  ;;  %v470_v43 = vpop.f32.mrb[1].mxu0 }
  0xf3   : > { %v361_v44 = vpop.f32.mrb[2].mxu0 }
  0xf4   : > { %v364_v45 = vadd.f32 %v359_v42, %v307_v41  ;;  %v471_v46 = vpop.f32.mrb[3].mxu0 }
  0xf6   : > { %366 = vst.msk [vmem:[%s255_s14] sm:$0xff] %vm365_vm4, %v364_v45 }
  0xf7   : > { %534 = shalt.err (!%p531_p3)
}
  0xf8   : > { %s535_s29 = scalar_lea.hbm %s698_s18, 128  ;;  %s539_s11 = scalar_lea.hbm %s746_s6, 256 }
  0xf9   : > { %p536_p4 = scmp.ne.s32.totalorder %s698_s18, %s535_s29  ;;  %p540_p9 = scmp.lt.u32.totalorder %s698_s18, %s746_s6 }
  0xfa   : > { %p541_p10 = scmp.lt.u32.totalorder %s539_s11, %s535_s29  ;;  %p543_p12 = scmp.lt.u32.totalorder %s535_s29, %s698_s18 }
  0xfb   : > { %p537_p7 = pnand %p536_p4, %p663_p5 }
  0xfc   : > { %p542_p11 = por %p541_p10, %p540_p9 }
  0xfd   : > { %p538_p8 = pneg %p537_p7 }
  0xfe   : > { %p544_p13 = por %p543_p12, %p542_p11 }
 0x100   : > { %p545_p0 = pnand %p544_p13, %p538_p8 }
 0x102   : > { %548 = shalt.err (!%p545_p0)
}
 0x103   : > { %472 = dma.vmem_to_hbm [thread:$0]  (%p663_p5), %s700_s15, 128, %s698_s18, %s368_s25  }
 0x104 PF: > { %p478_p1 = scmp.ge.s32.totalorder %s583_s24, 2  ;;  %s393_s14 = sand.u32 1, %s571_s21  }
 0x105   : > { %s394_s16 = scalar_lea.sflag [#allocation3], %s393_s14 }
 0x106   : > { %p475_p2 = pnand %p478_p1, %p667_p6 }
 0x108   : > { %566 = dma.done.wait (!%p475_p2), %s394_s16, 128  }
 0x109   : > { %568 = vsyncadd (!%p475_p2), %s394_s16, 4294967168  ;;  %p16_p3 = scmp.ge.s32.totalorder %s650_s27, 4   ;;  %s749_s21 = smov %s575_s22 }
 0x10a   : > { %s750_s22 = smov %s579_s23  ;;  %s751_s23 = smov %s661_s30 }
 0x10b   : > { %s752_s24 = smov %s650_s27  ;;  %18 = sbr.rel (!%p16_p3) target bundleno = 3 (0x3), region = 82 }
 0x112   :  { %399 = vsyncpa [#allocation3], 1 }
 0x113   :  { %401 = vsyncpa [#allocation3 + $0x1], 1 }

// kernel: residual_conv_block.2
= control target key start
LH: loop header
LB: loop body
LE: loop exit
PB: predicated region body
PF: predicated region fallthrough
CT: control target
= control target key end

     0   :  { %s699_s18 = smov 0   ;;  %s755_s0 = inlined_call_operand.vmem [shape: f32[2,4,16], index: 0, kind: input, shape index: {}]   ;;  %s756_s1 = inlined_call_operand.vmem [shape: bf16[16,8], index: 1, kind: input, shape index: {}]   ;;  %s757_s2 = inlined_call_operand.vmem [shape: bf16[3,8,4], index: 2, kind: input, shape index: {}]   ;;  %s758_s3 = inlined_call_operand.vmem [shape: bf16[2,8,8], index: 3, kind: output, shape index: {0}]   ;;  %s759_s4 = inlined_call_operand.vmem [shape: bf16[2,4,8], index: 4, kind: output, shape index: {1}]   ;;  %s760_s5 = inlined_call_operand.vmem [shape: f32[2,8,2], index: 5, kind: output, shape index: {2}]  }
   0x1 LB: > { %s589_s19 = sadd.s32 4294967295, %s663_s18   ;;  %p593_p0 = scmp.ge.s32.totalorder %s663_s18, 1  ;;  %s663_s18 = sphi %s699_s18, %s16_s18  }
   0x2   : > { %p191_p1 = scmp.lt.s32.totalorder %s663_s18, 3 }
   0x4   : > { %p192_p2 = pnand %p593_p0, %p191_p1 }
   0x5   : > { %v656_v0 = vld [vmem:[%s756_s1] sm:$0xff] (!%p192_p2)   ;;  %v665_v1 = vmov (!%p192_p2), 0.0   ;;  %p225_p3 = scmp.lt.s32.totalorder (!%p192_p2), %s589_s19, 1  ;;  %vm666_vm0 = vmmov (!%p192_p2), 0   ;;  %vm257_vm1 = vcmask (!%p192_p2), 130048   ;;  %vm469_vm2 = vcmask (!%p192_p2), 58368  }
   0x6   : > { %195 = sbr.rel (%p192_p2) target bundleno = 728 (0x2d8), region = 32  ;;  %615 = vmatprep.subr.bf16.mxu0 (!%p192_p2), %v665_v1  ;;  %627 = vmatprep.subr.bf16.mxu1 (!%p192_p2), %v665_v1  ;;  %vm318_vm3 = vcmask (!%p192_p2), 1041408   ;;  %s667_s30 = smov (!%p192_p2), 1   ;;  %v598_v10 = vld [vmem:[%s757_s2 + $0x4] sm:$0xf] (!%p192_p2)  ;;  %vm314_vm4 = vcmask (!%p192_p2), 31744  }
   0x7   : > { %616 = vmatpush3.bf16.msra.mxu0 (!%p192_p2), %v656_v0  ;;  %617 = vmatprep.mubr.msk.bf16.mxu0 (!%p192_p2), %vm666_vm0, %v665_v1  ;;  %s668_s8 = smov (!%p192_p2), 127   ;;  %vm305_vm5 = vcmask (!%p192_p2), 7168   ;;  %vm310_vm6 = vcmask (!%p192_p2), 56320   ;;  %v244_v17 = vld [vmem:[%s757_s2] sm:$0xf] (!%p192_p2)  ;;  %vm456_vm7 = vcmask (!%p192_p2), 64512  }
   0x8   : > { %621 = vmatprep.subr.bf16.mxu0 (!%p192_p2), %v665_v1  ;;  %629 = vmatprep.mubr.msk.bf16.mxu1 (!%p192_p2), %vm666_vm0, %v665_v1  ;;  %v599_v20 = vld [vmem:[%s757_s2 + $0x8] sm:$0xf] (!%p192_p2)  ;;  %vm467_vm8 = vcmask (!%p192_p2), 60416   ;;  %vm472_vm9 = vcmask (!%p192_p2), 15360  }
   0xd   : > { %s762_s19 = smov (!%p225_p3, %s589_s19), 1 }
   0xe   : > { %s594_s22 = sshll.u32 %s762_s19, 2  ;;  %s596_s26 = sshll.u32 %s762_s19, 1 }
   0xf   : > { %s228_s25 = scalar_lea.vmem %s755_s0, %s594_s22  ;;  %s236_s29 = scalar_lea.vmem %s759_s4, %s596_s26 }
  0x10   : > { %v249_v2 = vld [vmem:[%s228_s25] sm:$0xf]  ;;  %s232_s15 = scalar_lea.vmem %s758_s3, %s594_s22  ;;  %s597_s16 = sshll.u32 %s762_s19, 3 }
  0x11   : > { %v250_v3 = vpack.c.bf16 %v249_v2, %v249_v2  ;;  %s240_s21 = scalar_lea.vmem %s760_s5, %s597_s16 }
  0x13   : > { %618 = vmatmul.mubr.msk.bf16.vlgmr.msra.gmra.mrb[0].mxu0 %vm257_vm1, %v250_v3 }
  0x14   : > { %623 = vmatprep.mubr.msk.bf16.mxu0 %vm666_vm0, %v665_v1 }
  0xe6   : > { %v295_v4 = vpop.f32.mrb[0].mxu0 }
  0xe7   : > { %v312_v5 = vpack.c.bf16 %v295_v4, %v295_v4  ;;  %302 = vrot.lane.b32.xlu0 %v295_v4, %s667_s30  ;;  %v619_v6 = vpop.f32.mrb[1].mxu0 }
  0xe8   : > { %v298_v7 = vpop.f32.mrb[2].mxu0 }
  0xe9   : > { %470 = vst.msk [vmem:[%s236_s29] sm:$0x3] %vm469_vm2, %v312_v5  ;;  %v620_v8 = vpop.f32.mrb[3].mxu0  ;;  %v320_v9 = vsel %vm318_vm3, %v312_v5, 0 }
  0xea   : > { %622 = vmatpush3.bf16.msra.mxu0 %v320_v9 }
  0xeb   : > { %307 = vrot.lane.b32.xlu0 %v295_v4, %s668_s8 }
  0xed   : > { %624 = vmatmul.mubr.msk.bf16.vlgmr.msra.gmra.mrb[4].mxu0 %vm314_vm4, %v598_v10 }
 0x159   : > { %v303_v11 = vpop.permute.xlu0 %302 }
 0x15a   : > { %v306_v12 = vsel %vm305_vm5, 0.0, %v303_v11 }
 0x15b   : > { %v313_v13 = vpack.c.bf16 %v306_v12, %v306_v12 }
 0x15d   : > { %v308_v14 = vpop.permute.xlu0 %307  ;;  %v366_v15 = vsel %vm318_vm3, %v313_v13, 0 }
 0x15e   : > { %v311_v16 = vsel %vm310_vm6, %v308_v14, 0.0  ;;  %628 = vmatpush3.bf16.msra.mxu1 %v366_v15 }
 0x15f   : > { %v408_v18 = vpack.c.bf16 %v311_v16, %v311_v16  ;;  %633 = vmatprep.subr.bf16.mxu1 %v665_v1 }
 0x161   : > { %v413_v19 = vsel %vm318_vm3, %v408_v18, 0  ;;  %630 = vmatmul.mubr.msk.bf16.vlgmr.msra.gmra.mrb[0].mxu1 %vm314_vm4, %v244_v17 }
 0x162   : > { %634 = vmatpush3.bf16.msra.mxu1 %v413_v19  ;;  %635 = vmatprep.mubr.msk.bf16.mxu1 %vm666_vm0, %v665_v1 }
 0x16d   : > { %636 = vmatmul.mubr.msk.bf16.vlgmr.msra.gmra.mrb[0].mxu1 %vm314_vm4, %v599_v20 }
 0x1c0   : > { %v356_v21 = vpop.f32.mrb[4].mxu0 }
 0x1c1   : > { %v625_v22 = vpop.f32.mrb[5].mxu0 }
 0x1c2   : > { %v359_v23 = vpop.f32.mrb[6].mxu0 }
 0x1c3   : > { %v626_v24 = vpop.f32.mrb[7].mxu0 }
 0x240   : > { %v449_v25 = vpop.f32.mrb[0].mxu1 }
 0x241   : > { %v639_v26 = vadd.f32 %v449_v25, %v356_v21  ;;  %v637_v27 = vpop.f32.mrb[1].mxu1 }
 0x242   : > { %v452_v28 = vpop.f32.mrb[2].mxu1 }
 0x243   : > { %v466_v29 = vpack.c.bf16 %v639_v26, %v639_v26  ;;  %v638_v30 = vpop.f32.mrb[3].mxu1  ;;  %v457_v31 = vsel %vm456_vm7, %v639_v26, 0.0  ;;  %v461_v32 = vmul.f32 %v639_v26, %v639_v26 }
 0x244   : > { %458 = vadd.xlane.f32.xlu1 %v457_v31 }
 0x245   : > { %468 = vst.msk [vmem:[%s232_s15] sm:$0xf] %vm467_vm8, %v466_v29  ;;  %v462_v33 = vsel %vm456_vm7, %v461_v32, 0.0 }
 0x248   : > { %463 = vadd.xlane.f32.xlu1 %v462_v33 }
 0x2d1   : > { %v459_v34 = vpop.xlane.xlu1 %458 }
 0x2d5   : > { %v464_v35 = vpop.xlane.xlu1 %463 }
 0x2d6   : > { %v471_v36 = vsel %vm305_vm5, %v459_v34, %v464_v35 }
 0x2d7   : > { %473 = vst.msk [vmem:[%s240_s21] sm:$0xff] %vm472_vm9, %v471_v36 }
 0x2d8 PF: > { %s16_s18 = sadd.s32 1, %s663_s18  }
 0x2d9   : > { %p13_p4 = scmp.ge.s32.totalorder %s16_s18, 4  }
 0x2db   :  { %15 = sbr.rel (!%p13_p4) target bundleno = 1 (0x1), region = 88 }

</bundles_post_ra>
